<compile_context>
chip_gen: v6e
topology: v6e:2x2x1
jax: 0.10.0
libtpu: 0.0.40
codegen_flags: <defaults>
</compile_context>

<pallas_src>
import functools

import jax
import jax.numpy as jnp
import numpy as np
from jax.experimental import pallas as pl
from jax.experimental.pallas import tpu as pltpu


def _round_up(x, m):
    return ((x + m - 1) // m) * m


def _vmem_limit(estimate_bytes):
    # Estimate already counts double-buffering; add headroom, clamp below the
    # smallest physical VMEM (v7x: 64 MiB per TensorCore).
    return int(min(60 << 20, max(estimate_bytes + (4 << 20), 16 << 20)))


# ---------------------------------------------------------------------------
# Phase 1: h = feature @ weight       (row-tiled, weight VMEM-resident)
# ---------------------------------------------------------------------------
def _xw_kernel(feature_ref, weight_ref, h_ref):
    h_ref[...] = jnp.dot(
        feature_ref[...], weight_ref[...], preferred_element_type=jnp.float32
    ).astype(h_ref.dtype)


# ---------------------------------------------------------------------------
# Phase 2: out = edge @ h + bias      (row tiles x edge-column reduction)
#   - out block is VMEM-resident across k (index (i, 0)); accumulate in-place.
#   - k == 0 initializes the out block with the broadcast bias (f32).
# ---------------------------------------------------------------------------
def _aggregate_kernel(edge_ref, h_ref, bias_ref, out_ref, *, tile, h_resident):
    k = pl.program_id(1)

    @pl.when(k == 0)
    def _():
        out_ref[...] = jnp.broadcast_to(bias_ref[...], out_ref.shape)

    if h_resident:
        start = pl.multiple_of(k * tile, 128)
        h_blk = h_ref[pl.ds(start, tile), :]
    else:
        h_blk = h_ref[...]

    out_ref[...] += jnp.dot(edge_ref[...], h_blk,
                            preferred_element_type=jnp.float32)


# ---------------------------------------------------------------------------
# Tiny-graph path: single-block fused  edge @ (feature @ weight) + bias
# ---------------------------------------------------------------------------
def _fused_small_kernel(feature_ref, edge_ref, weight_ref, bias_ref, out_ref):
    h = jnp.dot(feature_ref[...], weight_ref[...],
                preferred_element_type=jnp.float32).astype(edge_ref.dtype)
    out_ref[...] = (
        jnp.dot(edge_ref[...], h, preferred_element_type=jnp.float32)
        + bias_ref[...]
    ).astype(out_ref.dtype)


def gcn_layer(feature, edge, weight, bias, *, max_tile=1024,
              mxu_dtype=jnp.bfloat16):
    """out = edge @ (feature @ weight) + bias (dense adjacency), via Pallas.

    mxu_dtype: dtype of the streamed MXU operands (edge/feature/weight/h);
    accumulation and the bias finalize stay f32.  Pass None for full f32.
    """
    n, in_dim = feature.shape
    out_dim = weight.shape[1]
    assert edge.shape == (n, n)
    f32 = jnp.float32

    op_dtype = f32 if mxu_dtype is None else mxu_dtype
    op_bytes = jnp.dtype(op_dtype).itemsize

    # Lane-dense padding: last dims -> multiples of 128; rows -> multiple of 128
    # (NOT of the tile -- tiles are chosen to divide n_p below).
    in_p = _round_up(in_dim, 128)
    out_p = _round_up(out_dim, 128)
    n_p = _round_up(n, 128)

    feature_p = jnp.pad(feature, ((0, n_p - n), (0, in_p - in_dim))).astype(op_dtype)
    edge_p = jnp.pad(edge, ((0, n_p - n), (0, n_p - n))).astype(op_dtype)
    weight_p = jnp.pad(weight, ((0, in_p - in_dim), (0, out_p - out_dim))).astype(op_dtype)
    bias_p = jnp.pad(bias.astype(f32), (0, out_p - out_dim)).reshape(1, out_p)

    # ---------------- tiny graphs: one fused single-block kernel --------------
    if n_p <= 128:
        est = 2 * (n_p * in_p + n_p * n_p + in_p * out_p) * op_bytes \
            + 2 * n_p * out_p * 4 + 2 * out_p * 4
        out_full = pl.pallas_call(
            _fused_small_kernel,
            out_shape=jax.ShapeDtypeStruct((n_p, out_p), f32),
            grid_spec=pltpu.PrefetchScalarGridSpec(
                num_scalar_prefetch=0,
                grid=(1,),
                in_specs=[
                    pl.BlockSpec((n_p, in_p), lambda i: (0, 0)),
                    pl.BlockSpec((n_p, n_p), lambda i: (0, 0)),
                    pl.BlockSpec((in_p, out_p), lambda i: (0, 0)),
                    pl.BlockSpec((1, out_p), lambda i: (0, 0)),
                ],
                out_specs=pl.BlockSpec((n_p, out_p), lambda i: (0, 0)),
            ),
            compiler_params=pltpu.CompilerParams(
                vmem_limit_bytes=_vmem_limit(est)),
        )(feature_p, edge_p, weight_p, bias_p)
        return out_full[:n, :out_dim]

    # ---------------- Phase 1 tile: large row tile, footprint-capped ----------
    cands1 = sorted(
        {c for c in range(128, min(n_p, 2048) + 1, 128) if n_p % c == 0},
        reverse=True)
    for t1 in cands1:
        p1_bytes = 2 * (t1 * in_p + in_p * out_p + t1 * out_p) * op_bytes
        if p1_bytes <= (40 << 20):
            break

    # ---------------- Phase 2 tile: divides n_p, prefers >= 2 row tiles -------
    cands2 = [c for c in range(128, min(max_tile, n_p) + 1, 128) if n_p % c == 0]
    multi = [c for c in cands2 if n_p // c >= 2]        # keep v7x's 2 TCs busy
    if multi:
        cands2 = multi
    cands2 = sorted(cands2, reverse=True)

    h_resident = n_p * out_p * op_bytes <= (4 << 20)     # keep whole h in VMEM
    for t in cands2:
        h_buf = 2 * (n_p if h_resident else t) * out_p * op_bytes
        p2_bytes = (2 * t * t * op_bytes + h_buf
                    + 2 * t * out_p * 4 + 2 * out_p * 4)
        if p2_bytes <= (40 << 20):
            break

    # ---------------- Phase 1: h = feature @ weight (computed once) -----------
    h = pl.pallas_call(
        _xw_kernel,
        out_shape=jax.ShapeDtypeStruct((n_p, out_p), op_dtype),
        grid_spec=pltpu.PrefetchScalarGridSpec(
            num_scalar_prefetch=0,
            grid=(n_p // t1,),
            in_specs=[
                pl.BlockSpec((t1, in_p), lambda i: (i, 0)),
                pl.BlockSpec((in_p, out_p), lambda i: (0, 0)),
            ],
            out_specs=pl.BlockSpec((t1, out_p), lambda i: (i, 0)),
        ),
        compiler_params=pltpu.CompilerParams(
            dimension_semantics=("parallel",),
            vmem_limit_bytes=_vmem_limit(p1_bytes)),
    )(feature_p, weight_p)

    # ---------------- Phase 2: out = edge @ h + bias ---------------------------
    if h_resident:
        h_spec = pl.BlockSpec((n_p, out_p), lambda i, k: (0, 0))  # DMA'd once
    else:
        h_spec = pl.BlockSpec((t, out_p), lambda i, k: (k, 0))    # stream k-slab

    kernel = functools.partial(_aggregate_kernel, tile=t, h_resident=h_resident)

    out_full = pl.pallas_call(
        kernel,
        out_shape=jax.ShapeDtypeStruct((n_p, out_p), f32),
        grid_spec=pltpu.PrefetchScalarGridSpec(
            num_scalar_prefetch=0,
            grid=(n_p // t, n_p // t),                 # (row tiles, k reduction)
            in_specs=[
                pl.BlockSpec((t, t), lambda i, k: (i, k)),        # edge tile
                h_spec,
                pl.BlockSpec((1, out_p), lambda i, k: (0, 0)),    # bias row
            ],
            out_specs=pl.BlockSpec((t, out_p), lambda i, k: (i, 0)),
        ),
        compiler_params=pltpu.CompilerParams(
            dimension_semantics=("parallel", "arbitrary"),
            vmem_limit_bytes=_vmem_limit(p2_bytes)),
    )(edge_p, h, bias_p)

    return out_full[:n, :out_dim]


def xavier_uniform(key, in_dim, out_dim, dtype=jnp.float32):
    # matches torch.nn.init.xavier_uniform_ (gain=1)
    bound = float(np.sqrt(6.0 / (in_dim + out_dim)))
    return jax.random.uniform(key, (in_dim, out_dim), dtype,
                              minval=-bound, maxval=bound)


if __name__ == "__main__":
    key = jax.random.PRNGKey(0)
    (k_feat, k_edge, k_w,
     k2_feat, k2_edge, k2_w,
     k3_feat, k3_edge, k3_w) = jax.random.split(key, 9)

    # ---- 1) Module-scale demo (N=8, 32->16): fused single-block path, f32 ----
    N, IN_DIM, OUT_DIM = 8, 32, 16
    feature = jax.random.normal(k_feat, (N, IN_DIM), jnp.float32)
    edge = jax.random.uniform(k_edge, (N, N), jnp.float32)      # dense adjacency
    weight = xavier_uniform(k_w, IN_DIM, OUT_DIM)               # module __init__
    bias = jnp.zeros((OUT_DIM,), jnp.float32)                   # module __init__

    out = jax.block_until_ready(gcn_layer(feature, edge, weight, bias,
                                          mxu_dtype=None))
    ref = (np.asarray(edge) @ (np.asarray(feature) @ np.asarray(weight))
           + np.asarray(bias))
    np.testing.assert_allclose(np.asarray(out), ref, rtol=1e-4, atol=1e-4)

    # ---- 2) Multi-tile grid + resident-output accumulator, full f32 ----------
    N2, IN2, OUT2 = 384, 256, 192
    feature2 = jax.random.normal(k2_feat, (N2, IN2), jnp.float32)
    edge2 = jax.random.uniform(k2_edge, (N2, N2), jnp.float32) / N2
    weight2 = xavier_uniform(k2_w, IN2, OUT2)
    bias2 = jnp.full((OUT2,), 0.1, jnp.float32)

    out2 = jax.block_until_ready(gcn_layer(feature2, edge2, weight2, bias2,
                                           mxu_dtype=None))
    ref2 = (np.asarray(edge2) @ (np.asarray(feature2) @ np.asarray(weight2))
            + np.asarray(bias2))
    np.testing.assert_allclose(np.asarray(out2), ref2, rtol=2e-3, atol=2e-3)

    # ---- 3) Default bf16-operand path (f32 accumulation), N=768 -> t=384 ------
    N3, IN3, OUT3 = 768, 256, 192
    feature3 = jax.random.normal(k3_feat, (N3, IN3), jnp.float32)
    edge3 = jax.random.uniform(k3_edge, (N3, N3), jnp.float32) / N3
    weight3 = xavier_uniform(k3_w, IN3, OUT3)
    bias3 = jnp.full((OUT3,), 0.1, jnp.float32)

    out3 = jax.block_until_ready(gcn_layer(feature3, edge3, weight3, bias3))
    ref3 = (np.asarray(edge3) @ (np.asarray(feature3) @ np.asarray(weight3))
            + np.asarray(bias3))
    np.testing.assert_allclose(np.asarray(out3), ref3, rtol=2e-2, atol=2e-2)

    print("KERNEL_OK")
</pallas_src>

<mosaic_0001>
module attributes {stable_mosaic.version = 11 : i64} {
  func.func @_fused_small_kernel(%arg0: i32, %arg1: memref<128x128xf32, #tpu.memory_space<vmem>>, %arg2: memref<128x128xf32, #tpu.memory_space<vmem>>, %arg3: memref<128x128xf32, #tpu.memory_space<vmem>>, %arg4: memref<1x128xf32, #tpu.memory_space<vmem>>, %arg5: memref<128x128xf32, #tpu.memory_space<vmem>>) attributes {dimension_semantics = [#tpu.dimension_semantics<arbitrary>], iteration_bounds = array<i64: 1>, scalar_prefetch = 0 : i64, scratch_operands = 0 : i64, tpu.core_type = #tpu.core_type<tc>, window_params = [{pipeline_mode = #tpu.pipeline_mode<synchronous>, transform_indices = @transform_0, window_bounds = array<i64: 128, 128>}, {pipeline_mode = #tpu.pipeline_mode<synchronous>, transform_indices = @transform_1, window_bounds = array<i64: 128, 128>}, {pipeline_mode = #tpu.pipeline_mode<synchronous>, transform_indices = @transform_2, window_bounds = array<i64: 128, 128>}, {pipeline_mode = #tpu.pipeline_mode<synchronous>, transform_indices = @transform_3, window_bounds = array<i64: 1, 128>}, {pipeline_mode = #tpu.pipeline_mode<synchronous>, transform_indices = @transform_4, window_bounds = array<i64: 128, 128>}]} {
    %c0 = arith.constant 0 : index
    %c0_0 = arith.constant 0 : index
    %0 = vector.load %arg1[%c0, %c0_0] : memref<128x128xf32, #tpu.memory_space<vmem>>, vector<128x128xf32>
    %c0_1 = arith.constant 0 : index
    %c0_2 = arith.constant 0 : index
    %1 = vector.load %arg3[%c0_1, %c0_2] : memref<128x128xf32, #tpu.memory_space<vmem>>, vector<128x128xf32>
    %cst = arith.constant dense<0.000000e+00> : vector<128x128xf32>
    %2 = tpu.matmul %0, %1, %cst {dimension_numbers = #tpu.dot_dimension_numbers<[1], [0], [0], [1], [0, 0, 1, 1], [], []>} : vector<128x128xf32>, vector<128x128xf32>, vector<128x128xf32> -> vector<128x128xf32>
    %c0_3 = arith.constant 0 : index
    %c0_4 = arith.constant 0 : index
    %3 = vector.load %arg2[%c0_3, %c0_4] : memref<128x128xf32, #tpu.memory_space<vmem>>, vector<128x128xf32>
    %cst_5 = arith.constant dense<0.000000e+00> : vector<128x128xf32>
    %4 = tpu.matmul %3, %2, %cst_5 {dimension_numbers = #tpu.dot_dimension_numbers<[1], [0], [0], [1], [0, 0, 1, 1], [], []>} : vector<128x128xf32>, vector<128x128xf32>, vector<128x128xf32> -> vector<128x128xf32>
    %c0_6 = arith.constant 0 : index
    %c0_7 = arith.constant 0 : index
    %5 = vector.load %arg4[%c0_6, %c0_7] : memref<1x128xf32, #tpu.memory_space<vmem>>, vector<1x128xf32>
    %6 = vector.broadcast %5 : vector<1x128xf32> to vector<128x128xf32>
    %7 = arith.addf %4, %6 : vector<128x128xf32>
    %c0_8 = arith.constant 0 : index
    %c0_9 = arith.constant 0 : index
    %8 = vector.load %arg5[%c0_8, %c0_9] : memref<128x128xf32, #tpu.memory_space<vmem>>, vector<128x128xf32>
    tpu.vector_store %arg5[%c0_8, %c0_9], %7 {strides = array<i32>} : memref<128x128xf32, #tpu.memory_space<vmem>>, vector<128x128xf32>,
    return
  }
  func.func @transform_0(%arg0: i32) -> (i32, i32) {
    %c0_i32 = arith.constant 0 : i32
    %c0_i32_0 = arith.constant 0 : i32
    %c0_i32_1 = arith.constant 0 : i32
    return %c0_i32, %c0_i32_0 : i32, i32
  }
  func.func @transform_1(%arg0: i32) -> (i32, i32) {
    %c0_i32 = arith.constant 0 : i32
    %c0_i32_0 = arith.constant 0 : i32
    %c0_i32_1 = arith.constant 0 : i32
    return %c0_i32, %c0_i32_0 : i32, i32
  }
  func.func @transform_2(%arg0: i32) -> (i32, i32) {
    %c0_i32 = arith.constant 0 : i32
    %c0_i32_0 = arith.constant 0 : i32
    %c0_i32_1 = arith.constant 0 : i32
    return %c0_i32, %c0_i32_0 : i32, i32
  }
  func.func @transform_3(%arg0: i32) -> (i32, i32) {
    %c0_i32 = arith.constant 0 : i32
    %c0_i32_0 = arith.constant 0 : i32
    %c0_i32_1 = arith.constant 0 : i32
    return %c0_i32, %c0_i32_0 : i32, i32
  }
  func.func @transform_4(%arg0: i32) -> (i32, i32) {
    %c0_i32 = arith.constant 0 : i32
    %c0_i32_0 = arith.constant 0 : i32
    %c0_i32_1 = arith.constant 0 : i32
    return %c0_i32, %c0_i32_0 : i32, i32
  }
}

</mosaic_0001>

<bundles_post_ra>
// kernel: tpu_custom_call.1
= control target key start
LH: loop header
LB: loop body
LE: loop exit
PB: predicated region body
PF: predicated region fallthrough
CT: control target
= control target key end

     0   :  { %9 = vsyncpa [#allocation3], 0  ;;  %s765_s0 = inlined_call_operand.hbm [shape: f32[128,128], index: 0, kind: input, shape index: {}]   ;;  %s766_s1 = inlined_call_operand.hbm [shape: f32[128,128], index: 1, kind: input, shape index: {}]   ;;  %s767_s2 = inlined_call_operand.hbm [shape: f32[128,128], index: 2, kind: input, shape index: {}]   ;;  %s768_s3 = inlined_call_operand.vmem [shape: f32[1,128], index: 3, kind: input, shape index: {}]   ;;  %s769_s4 = inlined_call_operand.hbm [shape: f32[128,128], index: 4, kind: output, shape index: {}]  }
   0x1   :  { %10 = vsyncpa [#allocation6], 0 }
   0x2   :  { %11 = vsyncpa [#allocation4], 0  ;;  %s707_s15 = smov [#allocation5]   ;;  %s708_s17 = smov [#allocation2]  }
   0x3   :  { %s29_s16 = sshll.u32 %s707_s15, 4  ;;  %s17_s18 = sshll.u32 %s708_s17, 4  ;;  %s30_s16 = int_to_ptr.vmem [resolvable:$true] %s29_s16  ;;  %s18_s18 = int_to_ptr.vmem [resolvable:$true] %s17_s18 }
   0x4   :  { %s629_s19 = scalar_lea.vmem %s30_s16, 2048  ;;  %p634_p1 = scmp.lt.s32.totalorder %s30_s16, %s30_s16 }
   0x5   :  { %p630_p0 = scmp.ne.s32.totalorder %s30_s16, %s629_s19  ;;  %p635_p2 = scmp.lt.s32.totalorder %s629_s19, %s629_s19 }
   0x7   :  { %p636_p3 = por %p635_p2, %p634_p1 }
   0x9   :  { %p637_p4 = pnand %p636_p3, %p630_p0 }
   0xb   :  { %640 = shalt.err (!%p637_p4)
}
   0xc   :  { %s709_s20 = smov 128   ;;  %s710_s21 = smov 8  }
   0xd   :  { %35 = dma.hbm_to_vmem [thread:$0]  %s766_s1, 2048, %s30_s16, [#allocation6], %s709_s20, %s709_s20, %s710_s21  }
   0xe   :  { %s649_s24 = scalar_lea.vmem %s18_s18, 2048  ;;  %p654_p6 = scmp.lt.s32.totalorder %s18_s18, %s18_s18 }
   0xf   :  { %p650_p5 = scmp.ne.s32.totalorder %s18_s18, %s649_s24  ;;  %p655_p7 = scmp.lt.s32.totalorder %s649_s24, %s649_s24 }
  0x11   :  { %p656_p8 = por %p655_p7, %p654_p6 }
  0x13   :  { %p657_p9 = pnand %p656_p8, %p650_p5 }
  0x15   :  { %660 = shalt.err (!%p657_p9)
}
  0x16   :  { %23 = dma.hbm_to_vmem [thread:$0]  %s765_s0, 2048, %s18_s18, [#allocation3], %s709_s20, %s709_s20, %s710_s21  }
  0x17   :  { %s711_s27 = smov [#allocation7]  }
  0x18   :  { %s41_s28 = sshll.u32 %s711_s27, 4  ;;  %s42_s28 = int_to_ptr.vmem [resolvable:$true] %s41_s28 }
  0x19   :  { %s669_s29 = scalar_lea.vmem %s42_s28, 2048  ;;  %p674_p11 = scmp.lt.s32.totalorder %s42_s28, %s42_s28 }
  0x1a   :  { %p670_p10 = scmp.ne.s32.totalorder %s42_s28, %s669_s29  ;;  %p675_p12 = scmp.lt.s32.totalorder %s669_s29, %s669_s29 }
  0x1c   :  { %p676_p13 = por %p675_p12, %p674_p11 }
  0x1e   :  { %p677_p0 = pnand %p676_p13, %p670_p10 }
  0x20   :  { %680 = shalt.err (!%p677_p0)
}
  0x21   :  { %47 = dma.hbm_to_vmem [thread:$0]  %s767_s2, 2048, %s42_s28, [#allocation6], %s709_s20, %s709_s20, %s710_s21  }
  0x22   :  { %701 = dma.done.wait [#allocation3], 2048  }
  0x23   :  { %702 = vsyncadd [#allocation3], 4294965248 }
  0x24   :  { %703 = dma.done.wait [#allocation6], 4096  }
  0x25   :  { %704 = vsyncadd [#allocation6], 4294963200  ;;  %v90_v0 = vld [vmem:[#allocation7 + $0x78] sm:$0xff]  ;;  %v89_v1 = vld [vmem:[#allocation7 + $0x70] sm:$0xff] }
  0x26   :  { %503 = vmatprep.subr.mxu0 %v90_v0  ;;  %v88_v2 = vld [vmem:[#allocation7 + $0x68] sm:$0xff]  ;;  %v87_v3 = vld [vmem:[#allocation7 + $0x60] sm:$0xff]  ;;  %v86_v5 = vld [vmem:[#allocation7 + $0x58] sm:$0xff] }
  0x27   :  { %504 = vmatpush3.msra.mxu0 %v90_v0  ;;  %v59_v4 = vld [vmem:[#allocation2] sm:$0xff]  ;;  %v85_v6 = vld [vmem:[#allocation7 + $0x50] sm:$0xff]  ;;  %v84_v7 = vld [vmem:[#allocation7 + $0x48] sm:$0xff] }
  0x28   :  { %505 = vmatprep.subr.mxu0 %v89_v1  ;;  %535 = vmatprep.mubr.f32.mxu0 %v59_v4  ;;  %v83_v8 = vld [vmem:[#allocation7 + $0x40] sm:$0xff]  ;;  %v82_v9 = vld [vmem:[#allocation7 + $0x38] sm:$0xff]  ;;  %v81_v10 = vld [vmem:[#allocation7 + $0x30] sm:$0xff] }
  0x29   :  { %506 = vmatpush3.msra.mxu0 %v89_v1  ;;  %v80_v11 = vld [vmem:[#allocation7 + $0x28] sm:$0xff]  ;;  %v79_v12 = vld [vmem:[#allocation7 + $0x20] sm:$0xff]  ;;  %v78_v13 = vld [vmem:[#allocation7 + $0x18] sm:$0xff] }
  0x2a   :  { %507 = vmatprep.subr.mxu0 %v88_v2  ;;  %v77_v14 = vld [vmem:[#allocation7 + $0x10] sm:$0xff]  ;;  %v76_v15 = vld [vmem:[#allocation7 + $0x8] sm:$0xff]  ;;  %v75_v16 = vld [vmem:[#allocation7] sm:$0xff] }
  0x2b   :  { %508 = vmatpush3.msra.mxu0 %v88_v2  ;;  %v60_v17 = vld [vmem:[#allocation2 + $0x8] sm:$0xff]  ;;  %v61_v18 = vld [vmem:[#allocation2 + $0x10] sm:$0xff]  ;;  %v62_v19 = vld [vmem:[#allocation2 + $0x18] sm:$0xff] }
  0x2c   :  { %509 = vmatprep.subr.mxu0 %v87_v3  ;;  %v63_v20 = vld [vmem:[#allocation2 + $0x20] sm:$0xff]  ;;  %v64_v21 = vld [vmem:[#allocation2 + $0x28] sm:$0xff]  ;;  %v65_v22 = vld [vmem:[#allocation2 + $0x30] sm:$0xff] }
  0x2d   :  { %510 = vmatpush3.msra.mxu0 %v87_v3  ;;  %v66_v23 = vld [vmem:[#allocation2 + $0x38] sm:$0xff]  ;;  %v67_v24 = vld [vmem:[#allocation2 + $0x40] sm:$0xff]  ;;  %v68_v25 = vld [vmem:[#allocation2 + $0x48] sm:$0xff] }
  0x2e   :  { %511 = vmatprep.subr.mxu0 %v86_v5  ;;  %v69_v26 = vld [vmem:[#allocation2 + $0x50] sm:$0xff]  ;;  %v70_v27 = vld [vmem:[#allocation2 + $0x58] sm:$0xff]  ;;  %v71_v28 = vld [vmem:[#allocation2 + $0x60] sm:$0xff] }
  0x2f   :  { %512 = vmatpush3.msra.mxu0 %v86_v5  ;;  %v72_v29 = vld [vmem:[#allocation2 + $0x68] sm:$0xff]  ;;  %v73_v30 = vld [vmem:[#allocation2 + $0x70] sm:$0xff]  ;;  %v74_v31 = vld [vmem:[#allocation2 + $0x78] sm:$0xff] }
  0x30   :  { %513 = vmatprep.subr.mxu0 %v85_v6  ;;  %v236_v32 = vld [vmem:[#allocation5] sm:$0xff]  ;;  %v237_v49 = vld [vmem:[#allocation5 + $0x8] sm:$0xff]  ;;  %v238_v50 = vld [vmem:[#allocation5 + $0x10] sm:$0xff] }
  0x31   :  { %514 = vmatpush3.msra.mxu0 %v85_v6  ;;  %591 = vmatprep.mubr.f32.mxu1 %v236_v32  ;;  %v239_v51 = vld [vmem:[#allocation5 + $0x18] sm:$0xff]  ;;  %v240_v52 = vld [vmem:[#allocation5 + $0x20] sm:$0xff]  ;;  %v241_v53 = vld [vmem:[#allocation5 + $0x28] sm:$0xff] }
  0x32   :  { %515 = vmatprep.subr.mxu0 %v84_v7  ;;  %v242_v54 = vld [vmem:[#allocation5 + $0x30] sm:$0xff]  ;;  %v243_v55 = vld [vmem:[#allocation5 + $0x38] sm:$0xff]  ;;  %v244_v56 = vld [vmem:[#allocation5 + $0x40] sm:$0xff] }
  0x33   :  { %516 = vmatpush3.msra.mxu0 %v84_v7  ;;  %v245_v57 = vld [vmem:[#allocation5 + $0x48] sm:$0xff]  ;;  %v246_v58 = vld [vmem:[#allocation5 + $0x50] sm:$0xff]  ;;  %v247_v59 = vld [vmem:[#allocation5 + $0x58] sm:$0xff] }
  0x34   :  { %517 = vmatprep.subr.mxu0 %v83_v8  ;;  %v248_v60 = vld [vmem:[#allocation5 + $0x60] sm:$0xff]  ;;  %v249_v61 = vld [vmem:[#allocation5 + $0x68] sm:$0xff]  ;;  %v250_v62 = vld [vmem:[#allocation5 + $0x70] sm:$0xff] }
  0x35   :  { %518 = vmatpush3.msra.mxu0 %v83_v8  ;;  %v251_v63 = vld [vmem:[#allocation5 + $0x78] sm:$0xff]  ;;  %v438_v0 = vld [vmem:[%s768_s3] ss:$0 sm:$0xff]  ;;  %s712_s3 = smov [#allocation8]  }
  0x36   :  { %519 = vmatprep.subr.mxu0 %v82_v9  ;;  %s425_s5 = sshll.u32 %s712_s3, 4  ;;  %s426_s5 = int_to_ptr.vmem [resolvable:$true] %s425_s5 }
  0x37   :  { %520 = vmatpush3.msra.mxu0 %v82_v9  ;;  %s681_s6 = scalar_lea.vmem %s426_s5, 2048  ;;  %p686_p2 = scmp.lt.s32.totalorder %s426_s5, %s426_s5 }
  0x38   :  { %521 = vmatprep.subr.mxu0 %v81_v10  ;;  %p682_p1 = scmp.ne.s32.totalorder %s426_s5, %s681_s6  ;;  %p687_p3 = scmp.lt.s32.totalorder %s681_s6, %s681_s6 }
  0x39   :  { %522 = vmatpush3.msra.mxu0 %v81_v10 }
  0x3a   :  { %523 = vmatprep.subr.mxu0 %v80_v11  ;;  %p688_p4 = por %p687_p3, %p686_p2 }
  0x3b   :  { %524 = vmatpush3.msra.mxu0 %v80_v11 }
  0x3c   :  { %525 = vmatprep.subr.mxu0 %v79_v12  ;;  %p689_p5 = pnand %p688_p4, %p682_p1 }
  0x3d   :  { %526 = vmatpush3.msra.mxu0 %v79_v12 }
  0x3e   :  { %527 = vmatprep.subr.mxu0 %v78_v13 }
  0x3f   :  { %528 = vmatpush3.msra.mxu0 %v78_v13 }
  0x40   :  { %529 = vmatprep.subr.mxu0 %v77_v14 }
  0x41   :  { %530 = vmatpush3.msra.mxu0 %v77_v14 }
  0x42   :  { %531 = vmatprep.subr.mxu0 %v76_v15 }
  0x43   :  { %532 = vmatpush3.msra.mxu0 %v76_v15 }
  0x44   :  { %533 = vmatprep.subr.mxu0 %v75_v16 }
  0x45   :  { %534 = vmatpush3.msra.mxu0 %v75_v16 }
  0x46   :  { %536 = vmatmul.mubr.f32.vlgmr.msra.gmra.mxu0 %v60_v17 }
  0x47   :  { %538 = vmatprep.mubr.f32.mxu0 %v61_v18 }
  0x4a   :  { %539 = vmatmul.mubr.f32.gmra.mxu0 %v62_v19 }
  0x4b   :  { %541 = vmatprep.mubr.f32.mxu0 %v63_v20 }
  0x4e   :  { %542 = vmatmul.mubr.f32.gmra.mxu0 %v64_v21 }
  0x4f   :  { %544 = vmatprep.mubr.f32.mxu0 %v65_v22 }
  0x52   :  { %545 = vmatmul.mubr.f32.gmra.mxu0 %v66_v23 }
  0x53   :  { %547 = vmatprep.mubr.f32.mxu0 %v67_v24 }
  0x56   :  { %548 = vmatmul.mubr.f32.gmra.mxu0 %v68_v25 }
  0x57   :  { %550 = vmatprep.mubr.f32.mxu0 %v69_v26 }
  0x5a   :  { %551 = vmatmul.mubr.f32.gmra.mxu0 %v70_v27 }
  0x5b   :  { %553 = vmatprep.mubr.f32.mxu0 %v71_v28 }
  0x5e   :  { %554 = vmatmul.mubr.f32.gmra.mxu0 %v72_v29 }
  0x5f   :  { %556 = vmatprep.mubr.f32.mxu0 %v73_v30 }
  0x62   :  { %557 = vmatmul.mubr.f32.gmra.mxu0 %v74_v31 }
 0x106   :  { %v537_v33 = vpop.f32.mrf.mxu0 }
 0x108   :  { %v157_v34 = vpop.f32.mrf.mxu0 }
 0x10a   :  { %v540_v35 = vpop.f32.mrf.mxu0 }
 0x10c   :  { %v167_v36 = vpop.f32.mrf.mxu0 }
 0x10e   :  { %v543_v37 = vpop.f32.mrf.mxu0 }
 0x110   :  { %v177_v38 = vpop.f32.mrf.mxu0 }
 0x112   :  { %v546_v39 = vpop.f32.mrf.mxu0 }
 0x114   :  { %v187_v40 = vpop.f32.mrf.mxu0 }
 0x116   :  { %v549_v41 = vpop.f32.mrf.mxu0 }
 0x118   :  { %v197_v42 = vpop.f32.mrf.mxu0 }
 0x11a   :  { %v552_v43 = vpop.f32.mrf.mxu0 }
 0x11c   :  { %v207_v44 = vpop.f32.mrf.mxu0 }
 0x11e   :  { %v555_v45 = vpop.f32.mrf.mxu0 }
 0x120   :  { %v217_v46 = vpop.f32.mrf.mxu0 }
 0x122   :  { %v558_v47 = vpop.f32.mrf.mxu0 }
 0x123   :  { %559 = vmatprep.subr.mxu1 %v558_v47 }
 0x124   :  { %v227_v48 = vpop.f32.mrf.mxu0  ;;  %560 = vmatpush3.msra.mxu1 %v558_v47 }
 0x125   :  { %561 = vmatprep.subr.mxu1 %v227_v48 }
 0x126   :  { %562 = vmatpush3.msra.mxu1 %v227_v48 }
 0x127   :  { %563 = vmatprep.subr.mxu1 %v555_v45 }
 0x128   :  { %564 = vmatpush3.msra.mxu1 %v555_v45 }
 0x129   :  { %565 = vmatprep.subr.mxu1 %v217_v46 }
 0x12a   :  { %566 = vmatpush3.msra.mxu1 %v217_v46 }
 0x12b   :  { %567 = vmatprep.subr.mxu1 %v552_v43 }
 0x12c   :  { %568 = vmatpush3.msra.mxu1 %v552_v43 }
 0x12d   :  { %569 = vmatprep.subr.mxu1 %v207_v44 }
 0x12e   :  { %570 = vmatpush3.msra.mxu1 %v207_v44 }
 0x12f   :  { %571 = vmatprep.subr.mxu1 %v549_v41 }
 0x130   :  { %572 = vmatpush3.msra.mxu1 %v549_v41 }
 0x131   :  { %573 = vmatprep.subr.mxu1 %v197_v42 }
 0x132   :  { %574 = vmatpush3.msra.mxu1 %v197_v42 }
 0x133   :  { %575 = vmatprep.subr.mxu1 %v546_v39 }
 0x134   :  { %576 = vmatpush3.msra.mxu1 %v546_v39 }
 0x135   :  { %577 = vmatprep.subr.mxu1 %v187_v40 }
 0x136   :  { %578 = vmatpush3.msra.mxu1 %v187_v40 }
 0x137   :  { %579 = vmatprep.subr.mxu1 %v543_v37 }
 0x138   :  { %580 = vmatpush3.msra.mxu1 %v543_v37 }
 0x139   :  { %581 = vmatprep.subr.mxu1 %v177_v38 }
 0x13a   :  { %582 = vmatpush3.msra.mxu1 %v177_v38 }
 0x13b   :  { %583 = vmatprep.subr.mxu1 %v540_v35 }
 0x13c   :  { %584 = vmatpush3.msra.mxu1 %v540_v35 }
 0x13d   :  { %585 = vmatprep.subr.mxu1 %v167_v36 }
 0x13e   :  { %586 = vmatpush3.msra.mxu1 %v167_v36 }
 0x13f   :  { %587 = vmatprep.subr.mxu1 %v537_v33 }
 0x140   :  { %588 = vmatpush3.msra.mxu1 %v537_v33 }
 0x141   :  { %589 = vmatprep.subr.mxu1 %v157_v34 }
 0x142   :  { %590 = vmatpush3.msra.mxu1 %v157_v34 }
 0x143   :  { %592 = vmatmul.mubr.f32.vlgmr.msra.gmra.mxu1 %v237_v49 }
 0x144   :  { %594 = vmatprep.mubr.f32.mxu1 %v238_v50 }
 0x147   :  { %595 = vmatmul.mubr.f32.gmra.mxu1 %v239_v51 }
 0x148   :  { %597 = vmatprep.mubr.f32.mxu1 %v240_v52 }
 0x14b   :  { %598 = vmatmul.mubr.f32.gmra.mxu1 %v241_v53 }
 0x14c   :  { %600 = vmatprep.mubr.f32.mxu1 %v242_v54 }
 0x14f   :  { %601 = vmatmul.mubr.f32.gmra.mxu1 %v243_v55 }
 0x150   :  { %603 = vmatprep.mubr.f32.mxu1 %v244_v56 }
 0x153   :  { %604 = vmatmul.mubr.f32.gmra.mxu1 %v245_v57 }
 0x154   :  { %606 = vmatprep.mubr.f32.mxu1 %v246_v58 }
 0x157   :  { %607 = vmatmul.mubr.f32.gmra.mxu1 %v247_v59 }
 0x158   :  { %609 = vmatprep.mubr.f32.mxu1 %v248_v60 }
 0x15b   :  { %610 = vmatmul.mubr.f32.gmra.mxu1 %v249_v61 }
 0x15c   :  { %612 = vmatprep.mubr.f32.mxu1 %v250_v62 }
 0x15f   :  { %613 = vmatmul.mubr.f32.gmra.mxu1 %v251_v63 }
 0x203   :  { %v593_v1 = vpop.f32.mrf.mxu1 }
 0x204   :  { %v331_v2 = vadd.f32 %v593_v1, %v438_v0 }
 0x205   :  { %v325_v3 = vpop.f32.mrf.mxu1 }
 0x206   :  { %405 = vst [vmem:[#allocation8 + $0x8] sm:$0xff] %v331_v2  ;;  %v326_v4 = vadd.f32 %v438_v0, %v325_v3 }
 0x207   :  { %v596_v5 = vpop.f32.mrf.mxu1 }
 0x208   :  { %404 = vst [vmem:[#allocation8] sm:$0xff] %v326_v4  ;;  %v341_v6 = vadd.f32 %v596_v5, %v438_v0 }
 0x209   :  { %v335_v7 = vpop.f32.mrf.mxu1 }
 0x20a   :  { %407 = vst [vmem:[#allocation8 + $0x18] sm:$0xff] %v341_v6  ;;  %v336_v8 = vadd.f32 %v438_v0, %v335_v7 }
 0x20b   :  { %v599_v9 = vpop.f32.mrf.mxu1 }
 0x20c   :  { %406 = vst [vmem:[#allocation8 + $0x10] sm:$0xff] %v336_v8  ;;  %v351_v10 = vadd.f32 %v599_v9, %v438_v0 }
 0x20d   :  { %v345_v11 = vpop.f32.mrf.mxu1 }
 0x20e   :  { %409 = vst [vmem:[#allocation8 + $0x28] sm:$0xff] %v351_v10  ;;  %v346_v12 = vadd.f32 %v438_v0, %v345_v11 }
 0x20f   :  { %v602_v13 = vpop.f32.mrf.mxu1 }
 0x210   :  { %408 = vst [vmem:[#allocation8 + $0x20] sm:$0xff] %v346_v12  ;;  %v361_v14 = vadd.f32 %v602_v13, %v438_v0 }
 0x211   :  { %v355_v15 = vpop.f32.mrf.mxu1 }
 0x212   :  { %411 = vst [vmem:[#allocation8 + $0x38] sm:$0xff] %v361_v14  ;;  %v356_v16 = vadd.f32 %v438_v0, %v355_v15 }
 0x213   :  { %v605_v17 = vpop.f32.mrf.mxu1 }
 0x214   :  { %410 = vst [vmem:[#allocation8 + $0x30] sm:$0xff] %v356_v16  ;;  %v371_v18 = vadd.f32 %v605_v17, %v438_v0 }
 0x215   :  { %v365_v19 = vpop.f32.mrf.mxu1 }
 0x216   :  { %413 = vst [vmem:[#allocation8 + $0x48] sm:$0xff] %v371_v18  ;;  %v366_v20 = vadd.f32 %v438_v0, %v365_v19 }
 0x217   :  { %v608_v21 = vpop.f32.mrf.mxu1 }
 0x218   :  { %412 = vst [vmem:[#allocation8 + $0x40] sm:$0xff] %v366_v20  ;;  %v381_v22 = vadd.f32 %v608_v21, %v438_v0 }
 0x219   :  { %v375_v23 = vpop.f32.mrf.mxu1 }
 0x21a   :  { %415 = vst [vmem:[#allocation8 + $0x58] sm:$0xff] %v381_v22  ;;  %v376_v24 = vadd.f32 %v438_v0, %v375_v23 }
 0x21b   :  { %v611_v25 = vpop.f32.mrf.mxu1 }
 0x21c   :  { %414 = vst [vmem:[#allocation8 + $0x50] sm:$0xff] %v376_v24  ;;  %v391_v26 = vadd.f32 %v611_v25, %v438_v0 }
 0x21d   :  { %v385_v27 = vpop.f32.mrf.mxu1 }
 0x21e   :  { %417 = vst [vmem:[#allocation8 + $0x68] sm:$0xff] %v391_v26  ;;  %v386_v28 = vadd.f32 %v438_v0, %v385_v27 }
 0x21f   :  { %v614_v29 = vpop.f32.mrf.mxu1 }
 0x220   :  { %416 = vst [vmem:[#allocation8 + $0x60] sm:$0xff] %v386_v28  ;;  %v401_v30 = vadd.f32 %v614_v29, %v438_v0 }
 0x221   :  { %v395_v31 = vpop.f32.mrf.mxu1 }
 0x222   :  { %419 = vst [vmem:[#allocation8 + $0x78] sm:$0xff] %v401_v30  ;;  %v396_v32 = vadd.f32 %v438_v0, %v395_v31 }
 0x224   :  { %418 = vst [vmem:[#allocation8 + $0x70] sm:$0xff] %v396_v32 }
 0x225   :  { %692 = shalt.err (!%p689_p5)
}
 0x226   :  { %431 = dma.vmem_to_hbm [thread:$0]  %s426_s5, 2048, %s769_s4, [#allocation4], %s709_s20, %s709_s20, %s710_s21  }
 0x227   :  { %705 = dma.done.wait [#allocation4], 2048  }
 0x228   :  { %706 = vsyncadd [#allocation4], 4294965248 }
 0x229   :  { %435 = vsyncpa [#allocation3], 1 }
 0x22a   :  { %436 = vsyncpa [#allocation6], 1 }
 0x22b   :  { %437 = vsyncpa [#allocation4], 1 }

</bundles_post_ra>
